<compile_context>
chip_gen: v6e
topology: v6e:2x2x1
jax: 0.10.0
libtpu: 0.0.40
codegen_flags: <defaults>
</compile_context>

<pallas_src>
import jax
import jax.numpy as jnp
from jax.experimental import pallas as pl
from jax.experimental.pallas import tpu as pltpu


def mlp_kernel(x_ref, w1_ref, b1_ref, w2_ref, b2_ref, o_ref):
    # fc1: bf16 MXU matmul, f32 accumulation; bias + ReLU in f32.
    h = jnp.dot(x_ref[...], w1_ref[...], preferred_element_type=jnp.float32)
    h = jnp.maximum(h + b1_ref[...], 0.0)            # b1 is [1, 128], broadcasts

    # fc2: bf16 MXU matmul, f32 accumulation. Padded output lanes carry a -1e30
    # bias so the softmax below ignores them (exp underflows to 0).
    logits = jnp.dot(h.astype(w2_ref.dtype), w2_ref[...],
                     preferred_element_type=jnp.float32)
    logits = logits + b2_ref[...]                    # b2 is [1, 128] (padded)

    # log_softmax along dim=1 (numerically stable, all in f32).
    m = jnp.max(logits, axis=1, keepdims=True)
    shifted = logits - m
    lse = jnp.log(jnp.sum(jnp.exp(shifted), axis=1, keepdims=True))
    o_ref[...] = (shifted - lse).astype(o_ref.dtype)


def net1_forward(x, w1, b1, w2, b2, *, max_tile_b=128):
    """x: [B, 1, 28, 28] (NCHW) or [B, 784]; w1: [784,128], w2: [128,10].
    Returns log-probs [B, 10] (f32)."""
    B = x.shape[0]
    x2d = x.reshape(B, -1)
    K, H = w1.shape          # 784, 128
    N = w2.shape[1]          # 10

    K_pad = pl.cdiv(K, 128) * 128            # 896
    N_pad = 128                              # lane-dense output
    TILE_B = min(max_tile_b, pl.cdiv(B, 8) * 8)
    B_pad = pl.cdiv(B, TILE_B) * TILE_B

    # bf16 inputs/weights for the MXU; zero-padding K / output-N is numerically free.
    x_p = jnp.zeros((B_pad, K_pad), jnp.bfloat16).at[:B, :K].set(
        x2d.astype(jnp.bfloat16))
    w1_p = jnp.zeros((K_pad, H), jnp.bfloat16).at[:K, :].set(w1.astype(jnp.bfloat16))
    w2_p = jnp.zeros((H, N_pad), jnp.bfloat16).at[:, :N].set(w2.astype(jnp.bfloat16))
    b1_p = b1.reshape(1, H).astype(jnp.float32)
    # Padded logit lanes get a huge negative bias -> ignored by max/exp/sum.
    b2_p = jnp.full((1, N_pad), -1e30, jnp.float32).at[0, :N].set(
        b2.astype(jnp.float32))

    cost = pl.CostEstimate(
        flops=2 * B * (K * H + H * N),
        transcendentals=B * N_pad,
        bytes_accessed=(x_p.size * 2 + w1_p.size * 2 + w2_p.size * 2
                        + b1_p.size * 4 + b2_p.size * 4 + B_pad * N_pad * 4),
    )

    out = pl.pallas_call(
        mlp_kernel,
        out_shape=jax.ShapeDtypeStruct((B_pad, N_pad), jnp.float32),
        grid=(B_pad // TILE_B,),
        in_specs=[
            pl.BlockSpec((TILE_B, K_pad), lambda i: (i, 0)),   # x: tiled over batch
            pl.BlockSpec((K_pad, H), lambda i: (0, 0)),        # w1: resident
            pl.BlockSpec((1, H), lambda i: (0, 0)),            # b1: resident
            pl.BlockSpec((H, N_pad), lambda i: (0, 0)),        # w2: resident
            pl.BlockSpec((1, N_pad), lambda i: (0, 0)),        # b2: resident
        ],
        out_specs=pl.BlockSpec((TILE_B, N_pad), lambda i: (i, 0)),
        compiler_params=pltpu.CompilerParams(
            dimension_semantics=("parallel",)),
        cost_estimate=cost,
    )(x_p, w1_p, b1_p, w2_p, b2_p)

    return out[:B, :N]


def init_params(key):
    """nn.Linear-style init: Uniform(-1/sqrt(fan_in), 1/sqrt(fan_in))."""
    k1, k2, k3, k4 = jax.random.split(key, 4)
    lim1 = 1.0 / jnp.sqrt(784.0)
    lim2 = 1.0 / jnp.sqrt(128.0)
    w1 = jax.random.uniform(k1, (784, 128), jnp.float32, -lim1, lim1)
    b1 = jax.random.uniform(k2, (128,), jnp.float32, -lim1, lim1)
    w2 = jax.random.uniform(k3, (128, 10), jnp.float32, -lim2, lim2)
    b2 = jax.random.uniform(k4, (10,), jnp.float32, -lim2, lim2)
    return w1, b1, w2, b2


if __name__ == "__main__":
    key = jax.random.PRNGKey(0)
    kx, kp = jax.random.split(key)

    # MNIST-like input: batch=8, NCHW [8, 1, 28, 28] -> flattened to 784 inside.
    x = jax.random.normal(kx, (8, 1, 28, 28), jnp.float32)
    w1, b1, w2, b2 = init_params(kp)

    out = net1_forward(x, w1, b1, w2, b2)
    out = jax.block_until_ready(out)
    assert out.shape == (8, 10)

    # Pure-JAX f32 reference (torch semantics). Kernel uses bf16 matmuls with
    # f32 accumulation, so compare with a bf16-appropriate tolerance.
    xf = x.reshape(8, -1)
    h = jnp.maximum(xf @ w1 + b1, 0.0)
    logits = h @ w2 + b2
    ref = logits - jax.scipy.special.logsumexp(logits, axis=1, keepdims=True)
    assert jnp.allclose(out, ref, atol=5e-2, rtol=0.0), \
        f"max abs err {jnp.max(jnp.abs(out - ref))}"
    assert bool(jnp.all(jnp.isfinite(out)))

    print("KERNEL_OK")
</pallas_src>

<mosaic_0001>
module attributes {stable_mosaic.version = 11 : i64} {
  func.func @mlp_kernel(%arg0: i32, %arg1: memref<8x896xbf16, #tpu.memory_space<vmem>>, %arg2: memref<896x128xbf16, #tpu.memory_space<vmem>>, %arg3: memref<1x128xf32, #tpu.memory_space<vmem>>, %arg4: memref<128x128xbf16, #tpu.memory_space<vmem>>, %arg5: memref<1x128xf32, #tpu.memory_space<vmem>>, %arg6: memref<8x128xf32, #tpu.memory_space<vmem>>) attributes {dimension_semantics = [#tpu.dimension_semantics<parallel>], iteration_bounds = array<i64: 1>, scalar_prefetch = 0 : i64, scratch_operands = 0 : i64, tpu.core_type = #tpu.core_type<tc>, window_params = [{transform_indices = @transform_0, window_bounds = array<i64: 8, 896>}, {pipeline_mode = #tpu.pipeline_mode<synchronous>, transform_indices = @transform_1, window_bounds = array<i64: 896, 128>}, {pipeline_mode = #tpu.pipeline_mode<synchronous>, transform_indices = @transform_2, window_bounds = array<i64: 1, 128>}, {pipeline_mode = #tpu.pipeline_mode<synchronous>, transform_indices = @transform_3, window_bounds = array<i64: 128, 128>}, {pipeline_mode = #tpu.pipeline_mode<synchronous>, transform_indices = @transform_4, window_bounds = array<i64: 1, 128>}, {transform_indices = @transform_5, window_bounds = array<i64: 8, 128>}]} {
    %c0 = arith.constant 0 : index
    %c0_0 = arith.constant 0 : index
    %0 = vector.load %arg1[%c0, %c0_0] : memref<8x896xbf16, #tpu.memory_space<vmem>>, vector<8x896xbf16>
    %c0_1 = arith.constant 0 : index
    %c0_2 = arith.constant 0 : index
    %1 = vector.load %arg2[%c0_1, %c0_2] : memref<896x128xbf16, #tpu.memory_space<vmem>>, vector<896x128xbf16>
    %cst = arith.constant dense<0.000000e+00> : vector<8x128xf32>
    %2 = tpu.matmul %0, %1, %cst {dimension_numbers = #tpu.dot_dimension_numbers<[1], [0], [0], [1], [0, 0, 1, 1], [], []>} : vector<8x896xbf16>, vector<896x128xbf16>, vector<8x128xf32> -> vector<8x128xf32>
    %c0_3 = arith.constant 0 : index
    %c0_4 = arith.constant 0 : index
    %3 = vector.load %arg3[%c0_3, %c0_4] : memref<1x128xf32, #tpu.memory_space<vmem>>, vector<1x128xf32>
    %4 = vector.broadcast %3 : vector<1x128xf32> to vector<8x128xf32>
    %5 = arith.addf %2, %4 : vector<8x128xf32>
    %cst_5 = arith.constant 0.000000e+00 : f32
    %6 = vector.broadcast %cst_5 : f32 to vector<8x128xf32>
    %7 = arith.maximumf %5, %6 : vector<8x128xf32>
    %8 = arith.truncf %7 : vector<8x128xf32> to vector<8x128xbf16>
    %c0_6 = arith.constant 0 : index
    %c0_7 = arith.constant 0 : index
    %9 = vector.load %arg4[%c0_6, %c0_7] : memref<128x128xbf16, #tpu.memory_space<vmem>>, vector<128x128xbf16>
    %cst_8 = arith.constant dense<0.000000e+00> : vector<8x128xf32>
    %10 = tpu.matmul %8, %9, %cst_8 {dimension_numbers = #tpu.dot_dimension_numbers<[1], [0], [0], [1], [0, 0, 1, 1], [], []>} : vector<8x128xbf16>, vector<128x128xbf16>, vector<8x128xf32> -> vector<8x128xf32>
    %c0_9 = arith.constant 0 : index
    %c0_10 = arith.constant 0 : index
    %11 = vector.load %arg5[%c0_9, %c0_10] : memref<1x128xf32, #tpu.memory_space<vmem>>, vector<1x128xf32>
    %12 = vector.broadcast %11 : vector<1x128xf32> to vector<8x128xf32>
    %13 = arith.addf %10, %12 : vector<8x128xf32>
    %cst_11 = arith.constant dense<0xFF800000> : vector<8xf32>
    %14 = vector.multi_reduction <maximumf>, %13, %cst_11 [1] : vector<8x128xf32> to vector<8xf32>
    %15 = vector.shape_cast %14 : vector<8xf32> to vector<8x1xf32>
    %16 = vector.broadcast %15 : vector<8x1xf32> to vector<8x128xf32>
    %17 = arith.subf %13, %16 : vector<8x128xf32>
    %18 = math.exp %17 : vector<8x128xf32>
    %cst_12 = arith.constant dense<0.000000e+00> : vector<8xf32>
    %19 = vector.multi_reduction <add>, %18, %cst_12 [1] : vector<8x128xf32> to vector<8xf32>
    %20 = vector.shape_cast %19 : vector<8xf32> to vector<8x1xf32>
    %21 = math.log %20 : vector<8x1xf32>
    %22 = vector.broadcast %21 : vector<8x1xf32> to vector<8x128xf32>
    %23 = arith.subf %17, %22 : vector<8x128xf32>
    %c0_13 = arith.constant 0 : index
    %c0_14 = arith.constant 0 : index
    %24 = vector.load %arg6[%c0_13, %c0_14] : memref<8x128xf32, #tpu.memory_space<vmem>>, vector<8x128xf32>
    tpu.vector_store %arg6[%c0_13, %c0_14], %23 {strides = array<i32>} : memref<8x128xf32, #tpu.memory_space<vmem>>, vector<8x128xf32>,
    return
  }
  func.func @transform_0(%arg0: i32) -> (i32, i32) {
    %c0_i32 = arith.constant 0 : i32
    %c0_i32_0 = arith.constant 0 : i32
    return %arg0, %c0_i32 : i32, i32
  }
  func.func @transform_1(%arg0: i32) -> (i32, i32) {
    %c0_i32 = arith.constant 0 : i32
    %c0_i32_0 = arith.constant 0 : i32
    %c0_i32_1 = arith.constant 0 : i32
    return %c0_i32, %c0_i32_0 : i32, i32
  }
  func.func @transform_2(%arg0: i32) -> (i32, i32) {
    %c0_i32 = arith.constant 0 : i32
    %c0_i32_0 = arith.constant 0 : i32
    %c0_i32_1 = arith.constant 0 : i32
    return %c0_i32, %c0_i32_0 : i32, i32
  }
  func.func @transform_3(%arg0: i32) -> (i32, i32) {
    %c0_i32 = arith.constant 0 : i32
    %c0_i32_0 = arith.constant 0 : i32
    %c0_i32_1 = arith.constant 0 : i32
    return %c0_i32, %c0_i32_0 : i32, i32
  }
  func.func @transform_4(%arg0: i32) -> (i32, i32) {
    %c0_i32 = arith.constant 0 : i32
    %c0_i32_0 = arith.constant 0 : i32
    %c0_i32_1 = arith.constant 0 : i32
    return %c0_i32, %c0_i32_0 : i32, i32
  }
  func.func @transform_5(%arg0: i32) -> (i32, i32) {
    %c0_i32 = arith.constant 0 : i32
    %c0_i32_0 = arith.constant 0 : i32
    return %arg0, %c0_i32 : i32, i32
  }
}

</mosaic_0001>

<bundles_post_ra>
// kernel: tpu_custom_call.1
= control target key start
LH: loop header
LB: loop body
LE: loop exit
PB: predicated region body
PF: predicated region fallthrough
CT: control target
= control target key end

     0   :  { %10 = vsyncpa [#allocation3], 0  ;;  %s1287_s0 = inlined_call_operand.hbm [shape: bf16[8,896], index: 0, kind: input, shape index: {}]   ;;  %s1288_s1 = inlined_call_operand.hbm [shape: bf16[896,128], index: 1, kind: input, shape index: {}]   ;;  %s1289_s2 = inlined_call_operand.vmem [shape: f32[1,128], index: 2, kind: input, shape index: {}]   ;;  %s1290_s3 = inlined_call_operand.hbm [shape: bf16[128,128], index: 3, kind: input, shape index: {}]   ;;  %s1291_s4 = inlined_call_operand.vmem [shape: f32[1,128], index: 4, kind: input, shape index: {}]   ;;  %s1292_s5 = inlined_call_operand.hbm [shape: f32[8,128], index: 5, kind: output, shape index: {}]  }
   0x1   :  { %11 = vsyncpa [#allocation6], 0 }
   0x2   :  { %12 = vsyncpa [#allocation4], 0  ;;  %s1211_s18 = smov [#allocation5]  }
   0x3   :  { %s28_s19 = sshll.u32 %s1211_s18, 4  ;;  %s29_s19 = int_to_ptr.vmem [resolvable:$true] %s28_s19 }
   0x4   :  { %s1133_s20 = scalar_lea.vmem %s29_s19, 7168  ;;  %p1138_p1 = scmp.lt.s32.totalorder %s29_s19, %s29_s19 }
   0x5   :  { %p1134_p0 = scmp.ne.s32.totalorder %s29_s19, %s1133_s20  ;;  %p1139_p2 = scmp.lt.s32.totalorder %s1133_s20, %s1133_s20 }
   0x7   :  { %p1140_p3 = por %p1139_p2, %p1138_p1 }
   0x9   :  { %p1141_p4 = pnand %p1140_p3, %p1134_p0 }
   0xb   :  { %1144 = shalt.err (!%p1141_p4)
}
   0xc   :  { %s1212_s21 = smov 64   ;;  %s1213_s22 = smov 4  }
   0xd   :  { %34 = dma.hbm_to_vmem [thread:$0]  %s1288_s1, 7168, %s29_s19, [#allocation6], %s1212_s21, %s1212_s21, %s1213_s22  }
   0xe   :  { %s1214_s25 = smov [#allocation2]   ;;  %s1215_s27 = smov [#allocation7]  }
   0xf   :  { %s19_s26 = sshll.u32 %s1214_s25, 4  ;;  %s42_s28 = sshll.u32 %s1215_s27, 4  ;;  %s20_s26 = int_to_ptr.vmem [resolvable:$true] %s19_s26  ;;  %s43_s28 = int_to_ptr.vmem [resolvable:$true] %s42_s28 }
  0x10   :  { %s1153_s29 = scalar_lea.vmem %s20_s26, 448  ;;  %p1158_p6 = scmp.lt.s32.totalorder %s20_s26, %s20_s26 }
  0x11   :  { %p1154_p5 = scmp.ne.s32.totalorder %s20_s26, %s1153_s29  ;;  %p1159_p7 = scmp.lt.s32.totalorder %s1153_s29, %s1153_s29 }
  0x13   :  { %p1160_p8 = por %p1159_p7, %p1158_p6 }
  0x15   :  { %p1161_p9 = pnand %p1160_p8, %p1154_p5 }
  0x17   :  { %1164 = shalt.err (!%p1161_p9)
}
  0x18   :  { %22 = dma.hbm_to_vmem [thread:$0]  %s1287_s0, 448, %s20_s26, [#allocation3]  }
  0x19   :  { %s1173_s7 = scalar_lea.vmem %s43_s28, 1024  ;;  %p1178_p11 = scmp.lt.s32.totalorder %s43_s28, %s43_s28 }
  0x1a   :  { %p1174_p10 = scmp.ne.s32.totalorder %s43_s28, %s1173_s7  ;;  %p1179_p12 = scmp.lt.s32.totalorder %s1173_s7, %s1173_s7 }
  0x1c   :  { %p1180_p13 = por %p1179_p12, %p1178_p11 }
  0x1e   :  { %p1181_p0 = pnand %p1180_p13, %p1174_p10 }
  0x20   :  { %1184 = shalt.err (!%p1181_p0)
}
  0x21   :  { %48 = dma.hbm_to_vmem [thread:$0]  %s1290_s3, 1024, %s43_s28, [#allocation6], %s1212_s21, %s1212_s21, %s1213_s22  }
  0x22   :  { %1205 = dma.done.wait [#allocation3], 448  }
  0x23   :  { %1206 = vsyncadd [#allocation3], 4294966848 }
  0x24   :  { %1207 = dma.done.wait [#allocation6], 8192  }
  0x25   :  { %1208 = vsyncadd [#allocation6], 4294959104  ;;  %v1050_v0 = vld [vmem:[#allocation5 + $0x78] sm:$0xff]   ;;  %v1054_v4 = vld [vmem:[#allocation5 + $0x70] sm:$0xff]   ;;  %v1216_v39 = vmov 0.0   ;;  %vm1217_vm0 = vmmov 0  }
  0x26   :  { %v1051_v1 = vld [vmem:[#allocation5 + $0xf8] sm:$0xff]   ;;  %918 = vmatprep.subr.bf16.mxu0 %v1050_v0  ;;  %v1055_v5 = vld [vmem:[#allocation5 + $0xf0] sm:$0xff]   ;;  %v1058_v8 = vld [vmem:[#allocation5 + $0x68] sm:$0xff]  }
  0x27   :  { %v1052_v2 = vld [vmem:[#allocation5 + $0x38] sm:$0xff]   ;;  %940 = vmatprep.subr.bf16.mxu1 %v1051_v1  ;;  %v1056_v6 = vld [vmem:[#allocation5 + $0x30] sm:$0xff]   ;;  %v1059_v9 = vld [vmem:[#allocation5 + $0xe8] sm:$0xff]  }
  0x28   :  { %v1053_v3 = vld [vmem:[#allocation5 + $0xb8] sm:$0xff]   ;;  %919 = vmatpush3.bf16.msra.mxu0 %v1052_v2  ;;  %v1057_v7 = vld [vmem:[#allocation5 + $0xb0] sm:$0xff]   ;;  %v1060_v10 = vld [vmem:[#allocation5 + $0x28] sm:$0xff]  }
  0x29   :  { %941 = vmatpush3.bf16.msra.mxu1 %v1053_v3  ;;  %920 = vmatprep.subr.bf16.mxu0 %v1054_v4  ;;  %v1061_v11 = vld [vmem:[#allocation5 + $0xa8] sm:$0xff]   ;;  %v1062_v12 = vld [vmem:[#allocation5 + $0x60] sm:$0xff]   ;;  %v1066_v16 = vld [vmem:[#allocation5 + $0x58] sm:$0xff]  }
  0x2a   :  { %942 = vmatprep.subr.bf16.mxu1 %v1055_v5  ;;  %v1063_v13 = vld [vmem:[#allocation5 + $0xe0] sm:$0xff]   ;;  %v1067_v17 = vld [vmem:[#allocation5 + $0xd8] sm:$0xff]   ;;  %v1070_v20 = vld [vmem:[#allocation5 + $0x50] sm:$0xff]  }
  0x2b   :  { %v1064_v14 = vld [vmem:[#allocation5 + $0x20] sm:$0xff]   ;;  %v1068_v18 = vld [vmem:[#allocation5 + $0x18] sm:$0xff]   ;;  %v1071_v21 = vld [vmem:[#allocation5 + $0xd0] sm:$0xff]  }
  0x2c   :  { %921 = vmatpush3.bf16.msra.mxu0 %v1056_v6  ;;  %v1065_v15 = vld [vmem:[#allocation5 + $0xa0] sm:$0xff]   ;;  %v1069_v19 = vld [vmem:[#allocation5 + $0x98] sm:$0xff]   ;;  %v1072_v22 = vld [vmem:[#allocation5 + $0x10] sm:$0xff]  }
  0x2d   :  { %943 = vmatpush3.bf16.msra.mxu1 %v1057_v7  ;;  %922 = vmatprep.subr.bf16.mxu0 %v1058_v8  ;;  %v1073_v23 = vld [vmem:[#allocation5 + $0x90] sm:$0xff]   ;;  %v1074_v24 = vld [vmem:[#allocation5 + $0x48] sm:$0xff]   ;;  %v1078_v28 = vld [vmem:[#allocation5 + $0x40] sm:$0xff]  }
  0x2e   :  { %944 = vmatprep.subr.bf16.mxu1 %v1059_v9  ;;  %v1075_v25 = vld [vmem:[#allocation5 + $0xc8] sm:$0xff]   ;;  %v1079_v29 = vld [vmem:[#allocation5 + $0xc0] sm:$0xff]   ;;  %v1086_v38 = vld [vmem:[#allocation5 + $0x178] sm:$0xff]  }
  0x2f   :  { %v1076_v26 = vld [vmem:[#allocation5 + $0x8] sm:$0xff]   ;;  %v1080_v30 = vld [vmem:[#allocation5] sm:$0xff]   ;;  %v1087_v40 = vld [vmem:[#allocation5 + $0x138] sm:$0xff]  }
  0x30   :  { %923 = vmatpush3.bf16.msra.mxu0 %v1060_v10  ;;  %v1077_v27 = vld [vmem:[#allocation5 + $0x88] sm:$0xff]   ;;  %v1081_v31 = vld [vmem:[#allocation5 + $0x80] sm:$0xff]   ;;  %v1088_v41 = vld [vmem:[#allocation5 + $0x1b8] sm:$0xff]  }
  0x31   :  { %945 = vmatpush3.bf16.msra.mxu1 %v1061_v11  ;;  %924 = vmatprep.subr.bf16.mxu0 %v1062_v12  ;;  %v61_v32 = vld [vmem:[#allocation2] sm:$0xff]  ;;  %v62_v33 = vld [vmem:[#allocation2 + $0x8] sm:$0xff]  ;;  %v1098_v51 = vld [vmem:[#allocation5 + $0x158] sm:$0xff]  }
  0x32   :  { %946 = vmatprep.subr.bf16.mxu1 %v1063_v13  ;;  %v846_v34 = vcombine.low %v61_v32, %v61_v32  ;;  %v847_v35 = vcombine.high %v61_v32, %v61_v32  ;;  %v848_v36 = vcombine.low %v62_v33, %v62_v33  ;;  %v849_v37 = vcombine.high %v62_v33, %v62_v33  ;;  %v1089_v42 = vld [vmem:[#allocation5 + $0x170] sm:$0xff]   ;;  %v1092_v45 = vld [vmem:[#allocation5 + $0x168] sm:$0xff]   ;;  %v1095_v48 = vld [vmem:[#allocation5 + $0x160] sm:$0xff]  }
  0x33   :  { %v1090_v43 = vld [vmem:[#allocation5 + $0x130] sm:$0xff]   ;;  %v1093_v46 = vld [vmem:[#allocation5 + $0x128] sm:$0xff]   ;;  %v1096_v49 = vld [vmem:[#allocation5 + $0x120] sm:$0xff]  }
  0x34   :  { %925 = vmatpush3.bf16.msra.mxu0 %v1064_v14  ;;  %577 = vmatprep.mubr.bf16.mxu0 %v847_v35  ;;  %v1091_v44 = vld [vmem:[#allocation5 + $0x1b0] sm:$0xff]   ;;  %v1094_v47 = vld [vmem:[#allocation5 + $0x1a8] sm:$0xff]   ;;  %v1097_v50 = vld [vmem:[#allocation5 + $0x1a0] sm:$0xff]  }
  0x35   :  { %947 = vmatpush3.bf16.msra.mxu1 %v1065_v15  ;;  %926 = vmatprep.subr.bf16.mxu0 %v1066_v16  ;;  %v1099_v52 = vld [vmem:[#allocation5 + $0x118] sm:$0xff]   ;;  %v1101_v54 = vld [vmem:[#allocation5 + $0x150] sm:$0xff]   ;;  %v1104_v57 = vld [vmem:[#allocation5 + $0x148] sm:$0xff]  }
  0x36   :  { %948 = vmatprep.subr.bf16.mxu1 %v1067_v17  ;;  %617 = vmatprep.mubr.bf16.mxu1 %v849_v37  ;;  %v1100_v53 = vld [vmem:[#allocation5 + $0x198] sm:$0xff]   ;;  %v1102_v55 = vld [vmem:[#allocation5 + $0x110] sm:$0xff]   ;;  %v1105_v58 = vld [vmem:[#allocation5 + $0x108] sm:$0xff]  }
  0x37   :  { %v1103_v56 = vld [vmem:[#allocation5 + $0x190] sm:$0xff]   ;;  %v1106_v59 = vld [vmem:[#allocation5 + $0x188] sm:$0xff]   ;;  %v1107_v61 = vld [vmem:[#allocation5 + $0x140] sm:$0xff]  }
  0x38   :  { %927 = vmatpush3.bf16.msra.mxu0 %v1068_v18  ;;  %v63_v60 = vld [vmem:[#allocation2 + $0x10] sm:$0xff]  ;;  %v1108_v63 = vld [vmem:[#allocation5 + $0x100] sm:$0xff]   ;;  %v1112_v2 = vld [vmem:[#allocation2 + $0x18] ss:$0 sps:$4 sm:$0xff]  }
  0x39   :  { %949 = vmatpush3.bf16.msra.mxu1 %v1069_v19  ;;  %928 = vmatprep.subr.bf16.mxu0 %v1070_v20  ;;  %v851_v62 = vcombine.high %v63_v60, %v63_v60  ;;  %v1109_v0 = vld [vmem:[#allocation5 + $0x180] sm:$0xff]   ;;  %v850_v1 = vcombine.low %v63_v60, %v63_v60  ;;  %v1113_v3 = vld [vmem:[#allocation7 + $0x38] sm:$0xff]   ;;  %v1114_v4 = vld [vmem:[#allocation7 + $0x30] sm:$0xff]  }
  0x3a   :  { %950 = vmatprep.subr.bf16.mxu1 %v1071_v21  ;;  %v1115_v5 = vld [vmem:[#allocation7 + $0x28] sm:$0xff]   ;;  %v1116_v6 = vld [vmem:[#allocation7 + $0x20] sm:$0xff]   ;;  %v1117_v7 = vld [vmem:[#allocation7 + $0x18] sm:$0xff]  }
  0x3b   :  { %v1118_v8 = vld [vmem:[#allocation7 + $0x10] sm:$0xff]   ;;  %v1119_v9 = vld [vmem:[#allocation7 + $0x8] sm:$0xff]   ;;  %v1120_v10 = vld [vmem:[#allocation7] sm:$0xff]  }
  0x3c   :  { %929 = vmatpush3.bf16.msra.mxu0 %v1072_v22  ;;  %v845_v20 = vld [vmem:[%s1289_s2] ss:$0 sm:$0xff]  ;;  %s1218_s2 = smov [#allocation8]  }
  0x3d   :  { %951 = vmatpush3.bf16.msra.mxu1 %v1073_v23  ;;  %930 = vmatprep.subr.bf16.mxu0 %v1074_v24  ;;  %v909_v37 = vld [vmem:[%s1291_s4] ss:$0 sm:$0xff]  ;;  %s835_s11 = sshll.u32 %s1218_s2, 4  ;;  %s836_s11 = int_to_ptr.vmem [resolvable:$true] %s835_s11 }
  0x3e   :  { %952 = vmatprep.subr.bf16.mxu1 %v1075_v25  ;;  %s1185_s4 = scalar_lea.vmem %s836_s11, 128  ;;  %p1190_p2 = scmp.lt.s32.totalorder %s836_s11, %s836_s11 }
  0x3f   :  { %p1186_p1 = scmp.ne.s32.totalorder %s836_s11, %s1185_s4  ;;  %p1191_p3 = scmp.lt.s32.totalorder %s1185_s4, %s1185_s4 }
  0x40   :  { %931 = vmatpush3.bf16.msra.mxu0 %v1076_v26 }
  0x41   :  { %953 = vmatpush3.bf16.msra.mxu1 %v1077_v27  ;;  %932 = vmatprep.subr.bf16.mxu0 %v1078_v28  ;;  %p1192_p4 = por %p1191_p3, %p1190_p2 }
  0x42   :  { %954 = vmatprep.subr.bf16.mxu1 %v1079_v29 }
  0x43   :  { %p1193_p5 = pnand %p1192_p4, %p1186_p1 }
  0x44   :  { %933 = vmatpush3.bf16.msra.mxu0 %v1080_v30 }
  0x45   :  { %955 = vmatpush3.bf16.msra.mxu1 %v1081_v31  ;;  %962 = vmatprep.subr.bf16.mxu0 %v1086_v38 }
  0x46   :  { %1002 = vmatprep.subr.bf16.mxu1 %v1216_v39 }
  0x47   :  { %578 = vmatmul.mubr.bf16.vlgmr.msra.gmra.mxu0 %v846_v34 }
  0x48   :  { %618 = vmatmul.mubr.bf16.vlgmr.msra.gmra.mxu1 %v848_v36  ;;  %963 = vmatpush3.bf16.msra.mxu0 %v1087_v40 }
  0x49   :  { %1003 = vmatpush3.bf16.msra.mxu1 %v1088_v41  ;;  %964 = vmatprep.subr.bf16.mxu0 %v1089_v42 }
  0x4a   :  { %1004 = vmatprep.subr.bf16.mxu1 %v1216_v39  ;;  %1018 = vmatprep.mubr.msk.bf16.mxu1 %vm1217_vm0, %v1216_v39 }
  0x4b   :  { %657 = vmatprep.mubr.bf16.mxu0 %v851_v62 }
  0x4c   :  { %965 = vmatpush3.bf16.msra.mxu0 %v1090_v43 }
  0x4d   :  { %1005 = vmatpush3.bf16.msra.mxu1 %v1091_v44  ;;  %966 = vmatprep.subr.bf16.mxu0 %v1092_v45 }
  0x4e   :  { %1006 = vmatprep.subr.bf16.mxu1 %v1216_v39 }
  0x50   :  { %967 = vmatpush3.bf16.msra.mxu0 %v1093_v46 }
  0x51   :  { %1007 = vmatpush3.bf16.msra.mxu1 %v1094_v47  ;;  %968 = vmatprep.subr.bf16.mxu0 %v1095_v48 }
  0x52   :  { %1008 = vmatprep.subr.bf16.mxu1 %v1216_v39 }
  0x54   :  { %969 = vmatpush3.bf16.msra.mxu0 %v1096_v49 }
  0x55   :  { %1009 = vmatpush3.bf16.msra.mxu1 %v1097_v50  ;;  %970 = vmatprep.subr.bf16.mxu0 %v1098_v51 }
  0x56   :  { %1010 = vmatprep.subr.bf16.mxu1 %v1216_v39 }
  0x58   :  { %971 = vmatpush3.bf16.msra.mxu0 %v1099_v52 }
  0x59   :  { %1011 = vmatpush3.bf16.msra.mxu1 %v1100_v53  ;;  %972 = vmatprep.subr.bf16.mxu0 %v1101_v54 }
  0x5a   :  { %1012 = vmatprep.subr.bf16.mxu1 %v1216_v39 }
  0x5c   :  { %973 = vmatpush3.bf16.msra.mxu0 %v1102_v55 }
  0x5d   :  { %1013 = vmatpush3.bf16.msra.mxu1 %v1103_v56  ;;  %974 = vmatprep.subr.bf16.mxu0 %v1104_v57 }
  0x5e   :  { %1014 = vmatprep.subr.bf16.mxu1 %v1216_v39 }
  0x60   :  { %975 = vmatpush3.bf16.msra.mxu0 %v1105_v58 }
  0x61   :  { %1015 = vmatpush3.bf16.msra.mxu1 %v1106_v59  ;;  %976 = vmatprep.subr.bf16.mxu0 %v1107_v61 }
  0x62   :  { %1016 = vmatprep.subr.bf16.mxu1 %v1216_v39 }
  0x64   :  { %977 = vmatpush3.bf16.msra.mxu0 %v1108_v63 }
  0x65   :  { %1017 = vmatpush3.bf16.msra.mxu1 %v1109_v0  ;;  %1022 = vmatprep.subr.bf16.mxu0 %v1216_v39 }
  0x67   :  { %658 = vmatmul.mubr.bf16.vlgmr.msra.gmra.mxu0 %v850_v1 }
  0x68   :  { %1019 = vmatmul.mubr.bf16.vlgmr.msra.gmra.mxu1 %v1112_v2  ;;  %1038 = vmatprep.mubr.msk.bf16.mxu0 %vm1217_vm0, %v1216_v39 }
  0x69   :  { %1023 = vmatpush3.bf16.msra.mxu0 %v1113_v3 }
  0x6a   :  { %1024 = vmatprep.subr.bf16.mxu0 %v1216_v39 }
  0x6d   :  { %1025 = vmatpush3.bf16.msra.mxu0 %v1114_v4 }
  0x6e   :  { %1026 = vmatprep.subr.bf16.mxu0 %v1216_v39 }
  0x71   :  { %1027 = vmatpush3.bf16.msra.mxu0 %v1115_v5 }
  0x72   :  { %1028 = vmatprep.subr.bf16.mxu0 %v1216_v39 }
  0x75   :  { %1029 = vmatpush3.bf16.msra.mxu0 %v1116_v6 }
  0x76   :  { %1030 = vmatprep.subr.bf16.mxu0 %v1216_v39 }
  0x79   :  { %1031 = vmatpush3.bf16.msra.mxu0 %v1117_v7 }
  0x7a   :  { %1032 = vmatprep.subr.bf16.mxu0 %v1216_v39 }
  0x7d   :  { %1033 = vmatpush3.bf16.msra.mxu0 %v1118_v8 }
  0x7e   :  { %1034 = vmatprep.subr.bf16.mxu0 %v1216_v39 }
  0x81   :  { %1035 = vmatpush3.bf16.msra.mxu0 %v1119_v9 }
  0x82   :  { %1036 = vmatprep.subr.bf16.mxu0 %v1216_v39 }
  0x85   :  { %1037 = vmatpush3.bf16.msra.mxu0 %v1120_v10 }
 0x107   :  { %v934_v11 = vpop.f32.mrf.mxu0 }
 0x108   :  { %v956_v12 = vpop.f32.mrf.mxu1 }
 0x109   :  { %v935_v13 = vpop.f32.mrf.mxu0 }
 0x10a   :  { %v957_v14 = vpop.f32.mrf.mxu1  ;;  %v936_v19 = vadd.f32 %v935_v13, %v934_v11 }
 0x10b   :  { %v937_v15 = vpop.f32.mrf.mxu0  ;;  %v958_v22 = vadd.f32 %v957_v14, %v956_v12 }
 0x10c   :  { %v959_v16 = vpop.f32.mrf.mxu1  ;;  %v580_v21 = vadd.f32 %v936_v19, %v845_v20 }
 0x10d   :  { %v938_v17 = vpop.f32.mrf.mxu0 }
 0x10e   :  { %v960_v18 = vpop.f32.mrf.mxu1  ;;  %v620_v26 = vadd.f32 %v958_v22, %v580_v21 }
 0x127   :  { %v978_v23 = vpop.f32.mrf.mxu0 }
 0x128   :  { %v699_v24 = vpop.f32.mrf.mxu1 }
 0x129   :  { %v979_v25 = vpop.f32.mrf.mxu0 }
 0x12a   :  { %v980_v27 = vadd.f32 %v979_v25, %v978_v23  ;;  %v1020_v28 = vpop.f32.mrf.mxu1 }
 0x12b   :  { %v981_v29 = vpop.f32.mrf.mxu0 }
 0x12c   :  { %v660_v30 = vadd.f32 %v980_v27, %v620_v26  ;;  %v702_v31 = vpop.f32.mrf.mxu1 }
 0x12d   :  { %v982_v32 = vpop.f32.mrf.mxu0 }
 0x12e   :  { %v700_v33 = vadd.f32 %v699_v24, %v660_v30  ;;  %v1021_v34 = vpop.f32.mrf.mxu1 }
 0x130   :  { %v705_v35 = vmax.f32 %v700_v33, 0.0 }
 0x132   :  { %v706_v36 = vpack.c.bf16 %v705_v35, %v705_v35 }
 0x134   :  { %1039 = vmatmul.mubr.bf16.vlgmr.msra.gmra.mxu0 %v706_v36 }
 0x1f4   :  { %v812_v38 = vpop.f32.mrf.mxu0 }
 0x1f5   :  { %v813_v39 = vadd.f32 %v909_v37, %v812_v38 }
 0x1f6   :  { %v1040_v40 = vpop.f32.mrf.mxu0 }
 0x1f7   :  { %818 = vmax.xlane.f32.xlu0 %v813_v39 }
 0x1f8   :  { %v815_v41 = vpop.f32.mrf.mxu0 }
 0x1fa   :  { %v1041_v42 = vpop.f32.mrf.mxu0 }
 0x280   :  { %v819_v43 = vpop.xlane.xlu0 %818 }
 0x281   :  { %v820_v44 = vsub.f32 %v813_v39, %v819_v43 }
 0x283   :  { %v821_v45 = vmul.f32 1.442695, %v820_v44 }
 0x285   :  { %1121 = vpow2.f32 %v821_v45 }
 0x292   :  { %v1122_v46 = vpop.eup %1121 }
 0x293   :  { %823 = vadd.xlane.f32.xlu0 %v1122_v46 }
 0x31c   :  { %v824_v47 = vpop.xlane.xlu0 %823 }
 0x31d   :  { %1123 = vlog2.f32 %v824_v47 }
 0x32a   :  { %v1124_v48 = vpop.eup %1123 }
 0x32b   :  { %v826_v49 = vmul.f32 0.6931472, %v1124_v48 }
 0x32d   :  { %v827_v50 = vsub.f32 %v820_v44, %v826_v49 }
 0x32f   :  { %828 = vst [vmem:[#allocation8] sm:$0xff] %v827_v50 }
 0x330   :  { %1196 = shalt.err (!%p1193_p5)
}
 0x331   :  { %838 = dma.vmem_to_hbm [thread:$0]  %s836_s11, 128, %s1292_s5, [#allocation4]  }
 0x332   :  { %1209 = dma.done.wait [#allocation4], 128  }
 0x333   :  { %1210 = vsyncadd [#allocation4], 4294967168 }
 0x334   :  { %842 = vsyncpa [#allocation3], 1 }
 0x335   :  { %843 = vsyncpa [#allocation6], 1 }
 0x336   :  { %844 = vsyncpa [#allocation4], 1 }

</bundles_post_ra>
